<compile_context>
chip_gen: v6e
topology: v6e:2x2x1
jax: 0.10.0
libtpu: 0.0.40
codegen_flags: <defaults>
</compile_context>

<pallas_src>
import jax
import jax.numpy as jnp
from jax.experimental import pallas as pl
from jax.experimental.pallas import tpu as pltpu

_LANES = 128          # lane-dense last dim
_MAX_TILE_ROWS = 1024 # 1024*128*4B = 512 KiB per input tile (f32); safe on v7x VMEM
_NUM_CORES = 2        # leading "parallel" grid axis (2 TCs on v7x; harmless on v5e/v6e)


def _ic_stats_kernel(pred_ref, label_ref, out_ref,
                     acc_x, acc_y, acc_xy, acc_xx, acc_yy):
    i = pl.program_id(1)

    @pl.when(i == 0)
    def _init():
        zero = jnp.zeros_like(acc_x)
        acc_x[...] = zero
        acc_y[...] = zero
        acc_xy[...] = zero
        acc_xx[...] = zero
        acc_yy[...] = zero

    x = pred_ref[...].astype(jnp.float32)
    y = label_ref[...].astype(jnp.float32)

    # Pure VPU elementwise accumulation; hides entirely under the input DMA.
    acc_x[...] += x
    acc_y[...] += y
    acc_xy[...] += x * y
    acc_xx[...] += x * x
    acc_yy[...] += y * y

    @pl.when(i == pl.num_programs(1) - 1)
    def _finalize():
        sx = jnp.sum(acc_x[...])
        sy = jnp.sum(acc_y[...])
        sxy = jnp.sum(acc_xy[...])
        sxx = jnp.sum(acc_xx[...])
        syy = jnp.sum(acc_yy[...])
        # Pack the 5 partial statistics into lanes 0..4 of a full (8,128) block
        # (unmasked full-width store; wrapper reads sublane 0).
        lane = jax.lax.broadcasted_iota(jnp.int32, (8, _LANES), 1)
        stats = (jnp.where(lane == 0, sx, 0.0)
                 + jnp.where(lane == 1, sy, 0.0)
                 + jnp.where(lane == 2, sxy, 0.0)
                 + jnp.where(lane == 3, sxx, 0.0)
                 + jnp.where(lane == 4, syy, 0.0))
        out_ref[...] = stats


def _round_up(x: int, m: int) -> int:
    return ((x + m - 1) // m) * m


@jax.jit
def ic_loss(pred: jax.Array, label: jax.Array) -> jax.Array:
    """Negative Pearson correlation between all elements of pred and label."""
    assert pred.shape == label.shape, "pred and label must have the same shape"
    n_total = pred.size
    x = pred.reshape(-1)
    y = label.reshape(-1)

    # Lane-dense (rows, 128) layout; pick tile size & padding.
    rows = pl.cdiv(n_total, _LANES)
    rows_per_core = pl.cdiv(rows, _NUM_CORES)
    tile_rows = min(_MAX_TILE_ROWS, _round_up(rows_per_core, 16))  # 16: bf16-safe
    blocks_per_core = pl.cdiv(rows_per_core, tile_rows)
    rows_pad = _NUM_CORES * blocks_per_core * tile_rows
    n_pad = rows_pad * _LANES

    if n_pad != n_total:
        # Zero padding does not perturb any of the accumulated sums.
        x = jnp.pad(x, (0, n_pad - n_total))
        y = jnp.pad(y, (0, n_pad - n_total))
    x = x.reshape(rows_pad, _LANES)
    y = y.reshape(rows_pad, _LANES)

    in_spec = pl.BlockSpec((tile_rows, _LANES),
                           lambda c, i: (c * blocks_per_core + i, 0))

    partial = pl.pallas_call(
        _ic_stats_kernel,
        out_shape=jax.ShapeDtypeStruct((_NUM_CORES, 8, _LANES), jnp.float32),
        grid_spec=pltpu.PrefetchScalarGridSpec(
            num_scalar_prefetch=0,
            grid=(_NUM_CORES, blocks_per_core),
            in_specs=[in_spec, in_spec],
            out_specs=pl.BlockSpec((None, 8, _LANES), lambda c, i: (c, 0, 0)),
            scratch_shapes=[pltpu.VMEM((tile_rows, _LANES), jnp.float32)] * 5,
        ),
        compiler_params=pltpu.CompilerParams(
            dimension_semantics=("parallel", "arbitrary"),
        ),
    )(x, y)

    # Combine per-core partial statistics and finalize in plain JAX.
    sums = jnp.sum(partial[:, 0, :], axis=0)  # lanes 0..4 hold sx, sy, sxy, sxx, syy
    sx, sy, sxy, sxx, syy = sums[0], sums[1], sums[2], sums[3], sums[4]
    n = jnp.float32(n_total)
    mx = sx / n
    my = sy / n
    cov = sxy - n * mx * my            # sum((x - mx) * (y - my))
    varx = sxx - n * mx * mx           # sum((x - mx)^2)
    vary = syy - n * my * my           # sum((y - my)^2)
    cost = cov * jax.lax.rsqrt(varx * vary)
    return -cost


def _ic_loss_ref(pred, label):
    vx = pred - jnp.mean(pred)
    vy = label - jnp.mean(label)
    cost = jnp.sum(vx * vy) / (
        jnp.sqrt(jnp.sum(vx ** 2)) * jnp.sqrt(jnp.sum(vy ** 2))
    )
    return -cost


if __name__ == "__main__":
    key = jax.random.PRNGKey(0)
    k1, k2, k3, k4 = jax.random.split(key, 4)

    # Case 1: 4-D tensor, 2*4*16*16 = 2048 elements (reshapes exactly to 16x128).
    pred1 = jax.random.normal(k1, (2, 4, 16, 16), dtype=jnp.float32)
    label1 = 0.5 * pred1 + 0.5 * jax.random.normal(k2, pred1.shape, dtype=jnp.float32)
    loss1 = jax.block_until_ready(ic_loss(pred1, label1))
    ref1 = jax.block_until_ready(_ic_loss_ref(pred1, label1))
    assert jnp.isfinite(loss1), "kernel produced non-finite loss (case 1)"
    assert abs(float(loss1) - float(ref1)) < 1e-4, (float(loss1), float(ref1))

    # Case 2: ragged size with non-zero mean (exercises the zero-padding path).
    pred2 = jax.random.normal(k3, (7, 33), dtype=jnp.float32) + 3.0
    label2 = 0.25 * pred2 + 0.75 * jax.random.normal(k4, pred2.shape, dtype=jnp.float32)
    loss2 = jax.block_until_ready(ic_loss(pred2, label2))
    ref2 = jax.block_until_ready(_ic_loss_ref(pred2, label2))
    assert jnp.isfinite(loss2), "kernel produced non-finite loss (case 2)"
    assert abs(float(loss2) - float(ref2)) < 5e-4, (float(loss2), float(ref2))

    print("KERNEL_OK")
</pallas_src>

<mosaic_0001>
module attributes {stable_mosaic.version = 11 : i64} {
  func.func @_ic_stats_kernel(%arg0: i32, %arg1: i32, %arg2: memref<16x128xf32, #tpu.memory_space<vmem>>, %arg3: memref<16x128xf32, #tpu.memory_space<vmem>>, %arg4: memref<1x8x128xf32, #tpu.memory_space<vmem>>, %arg5: memref<16x128xf32, #tpu.memory_space<vmem>>, %arg6: memref<16x128xf32, #tpu.memory_space<vmem>>, %arg7: memref<16x128xf32, #tpu.memory_space<vmem>>, %arg8: memref<16x128xf32, #tpu.memory_space<vmem>>, %arg9: memref<16x128xf32, #tpu.memory_space<vmem>>) attributes {dimension_semantics = [#tpu.dimension_semantics<parallel>, #tpu.dimension_semantics<arbitrary>], iteration_bounds = array<i64: 2, 1>, scalar_prefetch = 0 : i64, scratch_operands = 5 : i64, tpu.core_type = #tpu.core_type<tc>, window_params = [{transform_indices = @transform_0, window_bounds = array<i64: 16, 128>}, {transform_indices = @transform_1, window_bounds = array<i64: 16, 128>}, {transform_indices = @transform_2, window_bounds = array<i64: 1, 8, 128>}]} {
    %c0_i32 = arith.constant 0 : i32
    %0 = arith.cmpi eq, %arg1, %c0_i32 : i32
    %1 = arith.extui %0 : i1 to i32
    %c0_i32_0 = arith.constant 0 : i32
    %2 = arith.cmpi ne, %1, %c0_i32_0 : i32
    scf.if %2 {
      %cst = arith.constant 0.000000e+00 : f32
      %26 = vector.broadcast %cst : f32 to vector<16x128xf32>
      %c0_26 = arith.constant 0 : index
      %c0_27 = arith.constant 0 : index
      %27 = vector.load %arg5[%c0_26, %c0_27] : memref<16x128xf32, #tpu.memory_space<vmem>>, vector<16x128xf32>
      tpu.vector_store %arg5[%c0_26, %c0_27], %26 {strides = array<i32>} : memref<16x128xf32, #tpu.memory_space<vmem>>, vector<16x128xf32>,
      %c0_28 = arith.constant 0 : index
      %c0_29 = arith.constant 0 : index
      %28 = vector.load %arg6[%c0_28, %c0_29] : memref<16x128xf32, #tpu.memory_space<vmem>>, vector<16x128xf32>
      tpu.vector_store %arg6[%c0_28, %c0_29], %26 {strides = array<i32>} : memref<16x128xf32, #tpu.memory_space<vmem>>, vector<16x128xf32>,
      %c0_30 = arith.constant 0 : index
      %c0_31 = arith.constant 0 : index
      %29 = vector.load %arg7[%c0_30, %c0_31] : memref<16x128xf32, #tpu.memory_space<vmem>>, vector<16x128xf32>
      tpu.vector_store %arg7[%c0_30, %c0_31], %26 {strides = array<i32>} : memref<16x128xf32, #tpu.memory_space<vmem>>, vector<16x128xf32>,
      %c0_32 = arith.constant 0 : index
      %c0_33 = arith.constant 0 : index
      %30 = vector.load %arg8[%c0_32, %c0_33] : memref<16x128xf32, #tpu.memory_space<vmem>>, vector<16x128xf32>
      tpu.vector_store %arg8[%c0_32, %c0_33], %26 {strides = array<i32>} : memref<16x128xf32, #tpu.memory_space<vmem>>, vector<16x128xf32>,
      %c0_34 = arith.constant 0 : index
      %c0_35 = arith.constant 0 : index
      %31 = vector.load %arg9[%c0_34, %c0_35] : memref<16x128xf32, #tpu.memory_space<vmem>>, vector<16x128xf32>
      tpu.vector_store %arg9[%c0_34, %c0_35], %26 {strides = array<i32>} : memref<16x128xf32, #tpu.memory_space<vmem>>, vector<16x128xf32>,
    } else {
    }
    %c0 = arith.constant 0 : index
    %c0_1 = arith.constant 0 : index
    %3 = vector.load %arg2[%c0, %c0_1] : memref<16x128xf32, #tpu.memory_space<vmem>>, vector<16x128xf32>
    %c0_2 = arith.constant 0 : index
    %c0_3 = arith.constant 0 : index
    %4 = vector.load %arg3[%c0_2, %c0_3] : memref<16x128xf32, #tpu.memory_space<vmem>>, vector<16x128xf32>
    %c0_4 = arith.constant 0 : index
    %c0_5 = arith.constant 0 : index
    %5 = vector.load %arg5[%c0_4, %c0_5] : memref<16x128xf32, #tpu.memory_space<vmem>>, vector<16x128xf32>
    %6 = arith.addf %5, %3 : vector<16x128xf32>
    %c0_6 = arith.constant 0 : index
    %c0_7 = arith.constant 0 : index
    %7 = vector.load %arg5[%c0_6, %c0_7] : memref<16x128xf32, #tpu.memory_space<vmem>>, vector<16x128xf32>
    tpu.vector_store %arg5[%c0_6, %c0_7], %6 {strides = array<i32>} : memref<16x128xf32, #tpu.memory_space<vmem>>, vector<16x128xf32>,
    %c0_8 = arith.constant 0 : index
    %c0_9 = arith.constant 0 : index
    %8 = vector.load %arg6[%c0_8, %c0_9] : memref<16x128xf32, #tpu.memory_space<vmem>>, vector<16x128xf32>
    %9 = arith.addf %8, %4 : vector<16x128xf32>
    %c0_10 = arith.constant 0 : index
    %c0_11 = arith.constant 0 : index
    %10 = vector.load %arg6[%c0_10, %c0_11] : memref<16x128xf32, #tpu.memory_space<vmem>>, vector<16x128xf32>
    tpu.vector_store %arg6[%c0_10, %c0_11], %9 {strides = array<i32>} : memref<16x128xf32, #tpu.memory_space<vmem>>, vector<16x128xf32>,
    %c0_12 = arith.constant 0 : index
    %c0_13 = arith.constant 0 : index
    %11 = vector.load %arg7[%c0_12, %c0_13] : memref<16x128xf32, #tpu.memory_space<vmem>>, vector<16x128xf32>
    %12 = arith.mulf %3, %4 : vector<16x128xf32>
    %13 = arith.addf %11, %12 : vector<16x128xf32>
    %c0_14 = arith.constant 0 : index
    %c0_15 = arith.constant 0 : index
    %14 = vector.load %arg7[%c0_14, %c0_15] : memref<16x128xf32, #tpu.memory_space<vmem>>, vector<16x128xf32>
    tpu.vector_store %arg7[%c0_14, %c0_15], %13 {strides = array<i32>} : memref<16x128xf32, #tpu.memory_space<vmem>>, vector<16x128xf32>,
    %c0_16 = arith.constant 0 : index
    %c0_17 = arith.constant 0 : index
    %15 = vector.load %arg8[%c0_16, %c0_17] : memref<16x128xf32, #tpu.memory_space<vmem>>, vector<16x128xf32>
    %16 = arith.mulf %3, %3 : vector<16x128xf32>
    %17 = arith.addf %15, %16 : vector<16x128xf32>
    %c0_18 = arith.constant 0 : index
    %c0_19 = arith.constant 0 : index
    %18 = vector.load %arg8[%c0_18, %c0_19] : memref<16x128xf32, #tpu.memory_space<vmem>>, vector<16x128xf32>
    tpu.vector_store %arg8[%c0_18, %c0_19], %17 {strides = array<i32>} : memref<16x128xf32, #tpu.memory_space<vmem>>, vector<16x128xf32>,
    %c0_20 = arith.constant 0 : index
    %c0_21 = arith.constant 0 : index
    %19 = vector.load %arg9[%c0_20, %c0_21] : memref<16x128xf32, #tpu.memory_space<vmem>>, vector<16x128xf32>
    %20 = arith.mulf %4, %4 : vector<16x128xf32>
    %21 = arith.addf %19, %20 : vector<16x128xf32>
    %c0_22 = arith.constant 0 : index
    %c0_23 = arith.constant 0 : index
    %22 = vector.load %arg9[%c0_22, %c0_23] : memref<16x128xf32, #tpu.memory_space<vmem>>, vector<16x128xf32>
    tpu.vector_store %arg9[%c0_22, %c0_23], %21 {strides = array<i32>} : memref<16x128xf32, #tpu.memory_space<vmem>>, vector<16x128xf32>,
    %c0_i32_24 = arith.constant 0 : i32
    %23 = arith.cmpi eq, %arg1, %c0_i32_24 : i32
    %24 = arith.extui %23 : i1 to i32
    %c0_i32_25 = arith.constant 0 : i32
    %25 = arith.cmpi ne, %24, %c0_i32_25 : i32
    scf.if %25 {
      %c0_26 = arith.constant 0 : index
      %c0_27 = arith.constant 0 : index
      %26 = vector.load %arg5[%c0_26, %c0_27] : memref<16x128xf32, #tpu.memory_space<vmem>>, vector<16x128xf32>
      %27 = vector.shape_cast %26 : vector<16x128xf32> to vector<1x16x128xf32>
      %cst = arith.constant dense<0.000000e+00> : vector<1xf32>
      %28 = vector.multi_reduction <add>, %27, %cst [1, 2] : vector<1x16x128xf32> to vector<1xf32>
      %29 = vector.shape_cast %28 : vector<1xf32> to vector<1x1x1xf32>
      %30 = vector.extract %29[0, 0, 0] : f32 from vector<1x1x1xf32>
      %c0_28 = arith.constant 0 : index
      %c0_29 = arith.constant 0 : index
      %31 = vector.load %arg6[%c0_28, %c0_29] : memref<16x128xf32, #tpu.memory_space<vmem>>, vector<16x128xf32>
      %32 = vector.shape_cast %31 : vector<16x128xf32> to vector<1x16x128xf32>
      %cst_30 = arith.constant dense<0.000000e+00> : vector<1xf32>
      %33 = vector.multi_reduction <add>, %32, %cst_30 [1, 2] : vector<1x16x128xf32> to vector<1xf32>
      %34 = vector.shape_cast %33 : vector<1xf32> to vector<1x1x1xf32>
      %35 = vector.extract %34[0, 0, 0] : f32 from vector<1x1x1xf32>
      %c0_31 = arith.constant 0 : index
      %c0_32 = arith.constant 0 : index
      %36 = vector.load %arg7[%c0_31, %c0_32] : memref<16x128xf32, #tpu.memory_space<vmem>>, vector<16x128xf32>
      %37 = vector.shape_cast %36 : vector<16x128xf32> to vector<1x16x128xf32>
      %cst_33 = arith.constant dense<0.000000e+00> : vector<1xf32>
      %38 = vector.multi_reduction <add>, %37, %cst_33 [1, 2] : vector<1x16x128xf32> to vector<1xf32>
      %39 = vector.shape_cast %38 : vector<1xf32> to vector<1x1x1xf32>
      %40 = vector.extract %39[0, 0, 0] : f32 from vector<1x1x1xf32>
      %c0_34 = arith.constant 0 : index
      %c0_35 = arith.constant 0 : index
      %41 = vector.load %arg8[%c0_34, %c0_35] : memref<16x128xf32, #tpu.memory_space<vmem>>, vector<16x128xf32>
      %42 = vector.shape_cast %41 : vector<16x128xf32> to vector<1x16x128xf32>
      %cst_36 = arith.constant dense<0.000000e+00> : vector<1xf32>
      %43 = vector.multi_reduction <add>, %42, %cst_36 [1, 2] : vector<1x16x128xf32> to vector<1xf32>
      %44 = vector.shape_cast %43 : vector<1xf32> to vector<1x1x1xf32>
      %45 = vector.extract %44[0, 0, 0] : f32 from vector<1x1x1xf32>
      %c0_37 = arith.constant 0 : index
      %c0_38 = arith.constant 0 : index
      %46 = vector.load %arg9[%c0_37, %c0_38] : memref<16x128xf32, #tpu.memory_space<vmem>>, vector<16x128xf32>
      %47 = vector.shape_cast %46 : vector<16x128xf32> to vector<1x16x128xf32>
      %cst_39 = arith.constant dense<0.000000e+00> : vector<1xf32>
      %48 = vector.multi_reduction <add>, %47, %cst_39 [1, 2] : vector<1x16x128xf32> to vector<1xf32>
      %49 = vector.shape_cast %48 : vector<1xf32> to vector<1x1x1xf32>
      %50 = vector.extract %49[0, 0, 0] : f32 from vector<1x1x1xf32>
      %51 = tpu.iota {dimensions = array<i32: 1>} : vector<8x128xi32>
      %c0_i32_40 = arith.constant 0 : i32
      %52 = vector.broadcast %c0_i32_40 : i32 to vector<8x128xi32>
      %53 = arith.cmpi eq, %51, %52 : vector<8x128xi32>
      %cst_41 = arith.constant 0.000000e+00 : f32
      %54 = vector.broadcast %30 : f32 to vector<8x128xf32>
      %55 = vector.broadcast %cst_41 : f32 to vector<8x128xf32>
      %56 = arith.select %53, %54, %55 : vector<8x128xi1>, vector<8x128xf32>
      %c1_i32 = arith.constant 1 : i32
      %57 = vector.broadcast %c1_i32 : i32 to vector<8x128xi32>
      %58 = arith.cmpi eq, %51, %57 : vector<8x128xi32>
      %cst_42 = arith.constant 0.000000e+00 : f32
      %59 = vector.broadcast %35 : f32 to vector<8x128xf32>
      %60 = vector.broadcast %cst_42 : f32 to vector<8x128xf32>
      %61 = arith.select %58, %59, %60 : vector<8x128xi1>, vector<8x128xf32>
      %62 = arith.addf %56, %61 : vector<8x128xf32>
      %c2_i32 = arith.constant 2 : i32
      %63 = vector.broadcast %c2_i32 : i32 to vector<8x128xi32>
      %64 = arith.cmpi eq, %51, %63 : vector<8x128xi32>
      %cst_43 = arith.constant 0.000000e+00 : f32
      %65 = vector.broadcast %40 : f32 to vector<8x128xf32>
      %66 = vector.broadcast %cst_43 : f32 to vector<8x128xf32>
      %67 = arith.select %64, %65, %66 : vector<8x128xi1>, vector<8x128xf32>
      %68 = arith.addf %62, %67 : vector<8x128xf32>
      %c3_i32 = arith.constant 3 : i32
      %69 = vector.broadcast %c3_i32 : i32 to vector<8x128xi32>
      %70 = arith.cmpi eq, %51, %69 : vector<8x128xi32>
      %cst_44 = arith.constant 0.000000e+00 : f32
      %71 = vector.broadcast %45 : f32 to vector<8x128xf32>
      %72 = vector.broadcast %cst_44 : f32 to vector<8x128xf32>
      %73 = arith.select %70, %71, %72 : vector<8x128xi1>, vector<8x128xf32>
      %74 = arith.addf %68, %73 : vector<8x128xf32>
      %c4_i32 = arith.constant 4 : i32
      %75 = vector.broadcast %c4_i32 : i32 to vector<8x128xi32>
      %76 = arith.cmpi eq, %51, %75 : vector<8x128xi32>
      %cst_45 = arith.constant 0.000000e+00 : f32
      %77 = vector.broadcast %50 : f32 to vector<8x128xf32>
      %78 = vector.broadcast %cst_45 : f32 to vector<8x128xf32>
      %79 = arith.select %76, %77, %78 : vector<8x128xi1>, vector<8x128xf32>
      %80 = arith.addf %74, %79 : vector<8x128xf32>
      %c0_46 = arith.constant 0 : index
      %c0_47 = arith.constant 0 : index
      %c0_48 = arith.constant 0 : index
      %81 = vector.load %arg4[%c0_46, %c0_47, %c0_48] : memref<1x8x128xf32, #tpu.memory_space<vmem>>, vector<1x8x128xf32>
      %82 = vector.shape_cast %81 : vector<1x8x128xf32> to vector<8x128xf32>
      %83 = vector.shape_cast %80 : vector<8x128xf32> to vector<1x8x128xf32>
      tpu.vector_store %arg4[%c0_46, %c0_47, %c0_48], %83 {strides = array<i32>} : memref<1x8x128xf32, #tpu.memory_space<vmem>>, vector<1x8x128xf32>,
    } else {
    }
    return
  }
  func.func @transform_0(%arg0: i32, %arg1: i32) -> (i32, i32) {
    %c1_i32 = arith.constant 1 : i32
    %0 = arith.muli %arg0, %c1_i32 : i32
    %1 = arith.addi %0, %arg1 : i32
    %c0_i32 = arith.constant 0 : i32
    %c0_i32_0 = arith.constant 0 : i32
    return %1, %c0_i32 : i32, i32
  }
  func.func @transform_1(%arg0: i32, %arg1: i32) -> (i32, i32) {
    %c1_i32 = arith.constant 1 : i32
    %0 = arith.muli %arg0, %c1_i32 : i32
    %1 = arith.addi %0, %arg1 : i32
    %c0_i32 = arith.constant 0 : i32
    %c0_i32_0 = arith.constant 0 : i32
    return %1, %c0_i32 : i32, i32
  }
  func.func @transform_2(%arg0: i32, %arg1: i32) -> (i32, i32, i32) {
    %c0_i32 = arith.constant 0 : i32
    %c0_i32_0 = arith.constant 0 : i32
    %c0_i32_1 = arith.constant 0 : i32
    return %arg0, %c0_i32, %c0_i32_0 : i32, i32, i32
  }
}

</mosaic_0001>

<bundles_post_ra>
// kernel: ic_loss.1
= control target key start
LH: loop header
LB: loop body
LE: loop exit
PB: predicated region body
PF: predicated region fallthrough
CT: control target
= control target key end

     0   :  { %s489_s9 = smov 0   ;;  %s491_s10 = smov 0   ;;  %s530_s0 = inlined_call_operand.vmem [shape: f32[32,128], index: 0, kind: input, shape index: {}]   ;;  %s531_s1 = inlined_call_operand.vmem [shape: f32[32,128], index: 1, kind: input, shape index: {}]   ;;  %s532_s2 = inlined_call_operand.vmem [shape: f32[2,8,128], index: 2, kind: output, shape index: {}]  }
   0x1   :  { %s493_s11 = smov 0  }
   0x2 LB: > { %s24_s12 = sadd.s32 1, %s468_s10  ;;  %p408_p0 = scmp.ge.s32.totalorder %s472_s11, 1  ;;  %s472_s11 = sphi %s493_s11, %s12_s11   ;;  %s468_s10 = sphi %s491_s10, %s534_s10   ;;  %s464_s9 = sphi %s489_s9, %s533_s9  }
   0x3   : > { %p26_p1 = scmp.ge.s32.totalorder %s24_s12, 2  ;;  %p144_p2 = scmp.lt.s32.totalorder %s472_s11, 3 }
   0x5   : > { %s536_s12 = smov (%p26_p1, %s24_s12), 0  ;;  %p145_p3 = pnand %p408_p0, %p144_p2 }
   0x6   : > { %s409_s13 = sshll.u32 (!%p145_p3), %s464_s9, 1  ;;  %p188_p5 = scmp.lt.s32.totalorder (!%p145_p3), %s464_s9, 1 }
   0x7   : > { %148 = sbr.rel (%p145_p3) target bundleno = 233 (0xe9), region = 28  ;;  %p174_p4 = scmp.lt.s32.totalorder (!%p145_p3), %s409_s13, 3 }
   0xc   : > { %s538_s13 = smov (!%p174_p4, %s409_s13), 3  ;;  %v309_v50 = vlaneseq  ;;  %s540_s9 = smov (!%p188_p5, %s464_s9), 1 }
   0xd   : > { %s410_s14 = sshll.u32 %s538_s13, 3  ;;  %s413_s26 = sshll.u32 %s540_s9, 3 }
   0xe   : > { %s177_s17 = scalar_lea.vmem %s530_s0, %s410_s14  ;;  %s185_s20 = scalar_lea.vmem %s531_s1, %s410_s14  ;;  %v310_v51 = vand.u32 127, %v309_v50 }
   0xf   : > { %v206_v0 = vld [vmem:[%s177_s17] sm:$0xff]  ;;  %v207_v1 = vld [vmem:[%s177_s17 + $0x8] sm:$0xff]  ;;  %s191_s29 = scalar_lea.vmem %s532_s2, %s413_s26 }
  0x10   : > { %v208_v2 = vld [vmem:[%s185_s20] sm:$0xff]  ;;  %v251_v3 = vadd.f32 %v207_v1, %v206_v0  ;;  %v209_v4 = vld [vmem:[%s185_s20 + $0x8] sm:$0xff]  ;;  %v232_v7 = vmul.f32 %v206_v0, %v206_v0  ;;  %v233_v8 = vmul.f32 %v207_v1, %v207_v1  ;;  %vm311_vm0 = vcmp.eq.s32.totalorder %v310_v51, 0 }
  0x11   : > { %v224_v5 = vmul.f32 %v208_v2, %v206_v0  ;;  %v225_v6 = vmul.f32 %v209_v4, %v207_v1  ;;  %v263_v9 = vadd.f32 %v209_v4, %v208_v2  ;;  %v240_v10 = vmul.f32 %v208_v2, %v208_v2 }
  0x12   : > { %252 = vadd.xlane.f32.xlu0 %v251_v3  ;;  %v241_v11 = vmul.f32 %v209_v4, %v209_v4  ;;  %v287_v13 = vadd.f32 %v233_v8, %v232_v7  ;;  %vm314_vm1 = vcmp.eq.s32.totalorder %v310_v51, 1  ;;  %vm318_vm2 = vcmp.eq.s32.totalorder %v310_v51, 2 }
  0x13   : > { %v275_v12 = vadd.f32 %v225_v6, %v224_v5  ;;  %vm322_vm3 = vcmp.eq.s32.totalorder %v310_v51, 3  ;;  %vm326_vm4 = vcmp.eq.s32.totalorder %v310_v51, 4 }
  0x14   : > { %v299_v14 = vadd.f32 %v241_v11, %v240_v10 }
  0x15   : > { %276 = vadd.xlane.f32.xlu1 %v275_v12 }
  0x16   : > { %264 = vadd.xlane.f32.xlu0 %v263_v9 }
  0x19   : > { %288 = vadd.xlane.f32.xlu1 %v287_v13 }
  0x1a   : > { %300 = vadd.xlane.f32.xlu0 %v299_v14 }
  0x9b   : > { %v253_v15 = vpop.xlane.xlu0 %252 }
  0x9c   : > { %v254_v16 = vrot.slane %v253_v15, 4 }
  0x9e   : > { %v255_v17 = vadd.f32 %v254_v16, %v253_v15  ;;  %v277_v18 = vpop.xlane.xlu1 %276 }
  0x9f   : > { %v278_v19 = vrot.slane %v277_v18, 4  ;;  %v265_v20 = vpop.xlane.xlu0 %264 }
  0xa0   : > { %v256_v21 = vrot.slane %v255_v17, 2  ;;  %v266_v22 = vrot.slane %v265_v20, 4 }
  0xa1   : > { %v279_v23 = vadd.f32 %v278_v19, %v277_v18 }
  0xa2   : > { %v267_v24 = vadd.f32 %v266_v22, %v265_v20  ;;  %v289_v25 = vpop.xlane.xlu1 %288  ;;  %v257_v26 = vadd.f32 %v256_v21, %v255_v17 }
  0xa3   : > { %v280_v27 = vrot.slane %v279_v23, 2  ;;  %v290_v28 = vrot.slane %v289_v25, 4  ;;  %v301_v29 = vpop.xlane.xlu0 %300 }
  0xa4   : > { %v268_v30 = vrot.slane %v267_v24, 2  ;;  %v302_v31 = vrot.slane %v301_v29, 4  ;;  %v258_v32 = vrot.slane %v257_v26, 1 }
  0xa5   : > { %v291_v33 = vadd.f32 %v290_v28, %v289_v25  ;;  %v281_v34 = vadd.f32 %v280_v27, %v279_v23 }
  0xa6   : > { %v303_v35 = vadd.f32 %v302_v31, %v301_v29  ;;  %v259_v36 = vadd.f32 %v258_v32, %v257_v26  ;;  %v269_v37 = vadd.f32 %v268_v30, %v267_v24 }
  0xa7   : > { %v292_v38 = vrot.slane %v291_v33, 2  ;;  %v282_v39 = vrot.slane %v281_v34, 1 }
  0xa8   : > { %v304_v40 = vrot.slane %v303_v35, 2  ;;  %416 = vpush %v259_v36  ;;  %v270_v41 = vrot.slane %v269_v37, 1 }
  0xa9   : > { %v293_v42 = vadd.f32 %v292_v38, %v291_v33  ;;  %v283_v45 = vadd.f32 %v282_v39, %v281_v34 }
  0xaa   : > { %v305_v43 = vadd.f32 %v304_v40, %v303_v35  ;;  %v271_v44 = vadd.f32 %v270_v41, %v269_v37 }
  0xab   : > { %v294_v46 = vrot.slane %v293_v42, 1 }
  0xac   : > { %418 = vpush %v271_v44  ;;  %v306_v47 = vrot.slane %v305_v43, 1 }
  0xad   : > { %420 = vpush %v283_v45  ;;  %v295_v48 = vadd.f32 %v294_v46, %v293_v42 }
  0xae   : > { %v307_v49 = vadd.f32 %v306_v47, %v305_v43 }
  0xaf   : > { %422 = vpush %v295_v48 }
  0xb0   : > { %424 = vpush %v307_v49 }
  0xd9   : > { %s417_s21 = spop %416 }
  0xda   : > { %v312_v52 = vstv %s417_s21 }
  0xdb   : > { %v313_v54 = vsel %vm311_vm0, %v312_v52, 0.0 }
  0xdd   : > { %s419_s22 = spop %418 }
  0xde   : > { %v315_v53 = vstv %s419_s22  ;;  %s421_s23 = spop %420 }
  0xdf   : > { %v316_v55 = vsel %vm314_vm1, %v315_v53, 0.0  ;;  %v319_v56 = vstv %s421_s23 }
  0xe0   : > { %v317_v57 = vadd.f32 %v316_v55, %v313_v54  ;;  %s423_s24 = spop %422  ;;  %v320_v58 = vsel %vm318_vm2, %v319_v56, 0.0 }
  0xe1   : > { %v323_v59 = vstv %s423_s24  ;;  %s425_s25 = spop %424 }
  0xe2   : > { %v321_v60 = vadd.f32 %v320_v58, %v317_v57  ;;  %v327_v61 = vstv %s425_s25  ;;  %v324_v62 = vsel %vm322_vm3, %v323_v59, 0.0 }
  0xe3   : > { %v328_v0 = vsel %vm326_vm4, %v327_v61, 0.0 }
  0xe4   : > { %v325_v63 = vadd.f32 %v324_v62, %v321_v60 }
  0xe6   : > { %v329_v1 = vadd.f32 %v328_v0, %v325_v63 }
  0xe8   : > { %330 = vst [vmem:[%s191_s29] sm:$0xff] %v329_v1 }
  0xe9 PF: > { %s12_s11 = sadd.s32 1, %s472_s11   ;;  %s533_s9 = smov %s468_s10 }
  0xea   : > { %p9_p6 = scmp.ge.s32.totalorder %s12_s11, 4   ;;  %s534_s10 = smov %s536_s12 }
  0xec   :  { %11 = sbr.rel (!%p9_p6) target bundleno = 2 (0x2), region = 69 }

</bundles_post_ra>
